<compile_context>
chip_gen: v6e
topology: v6e:2x2x1
jax: 0.10.0
libtpu: 0.0.40
codegen_flags: <defaults>
</compile_context>

<pallas_src>
import jax
import jax.numpy as jnp
from jax.experimental import pallas as pl
from jax.experimental.pallas import tpu as pltpu

R_NFEATURE = 14    # room node feature dim (from Decoder.__init__)
F_LATENT = 64      # furniture latent dim (nodes_in_dims['furniture'] of gatlayer1)
LANES = 128        # lane-dense output width (2*F_LATENT == 128 >= R_NFEATURE+F_LATENT)


def _round_up(x, m):
    return ((x + m - 1) // m) * m


# ----------------------------------------------------------------------------
# Fused kernel (one grid step handles one tile of "edge rows"):
#   z = mu + exp(0.5 * log_var) * eps                          (EUP exp + VPU)
#   table = stacked block-diagonal node table   [3*Nf+Nr (pad8), 128]
#   out[e] = two_hot(idx[e]) @ table             (single MXU matmul per tile)
# where idx rows encode:
#   ff edge   : (src,            Nf + dst)        -> z|z     in lanes [0,128)
#   rf edge   : (2*Nf + src,     2*Nf + Nr + dst) -> room|z  in lanes [0,78)
#   z identity: (i,              -1)              -> z[i]    in lanes [0,64)
# ----------------------------------------------------------------------------
def _decoder_init_kernel(mu_ref, logvar_ref, eps_ref, room_ref, idx_ref, out_ref):
    nf, d = mu_ref.shape
    nr, dr = room_ref.shape

    # reparameterization, O(Nf*D) per grid step (tiny vs the per-tile matmul)
    z = mu_ref[...] + jnp.exp(0.5 * logvar_ref[...]) * eps_ref[...]
    room = room_ref[...]

    def place(x, start):
        """Embed x into a 128-lane block with its features starting at `start`."""
        rows, width = x.shape
        parts = []
        if start > 0:
            parts.append(jnp.zeros((rows, start), jnp.float32))
        parts.append(x)
        tail = LANES - start - width
        if tail > 0:
            parts.append(jnp.zeros((rows, tail), jnp.float32))
        return jnp.concatenate(parts, axis=1) if len(parts) > 1 else x

    # Stacked block-diagonal table (lane shuffles once per NODE row):
    #   rows [0,      nf)      : z    -> lanes [0,  d)    (ff src half / z rows)
    #   rows [nf,     2nf)     : z    -> lanes [d,  2d)   (ff dst half)
    #   rows [2nf,    2nf+nr)  : room -> lanes [0,  dr)   (rf src half)
    #   rows [2nf+nr, 3nf+nr)  : z    -> lanes [dr, dr+d) (rf dst half)
    table = jnp.concatenate(
        [place(z, 0), place(z, d), place(room, 0), place(z, dr)], axis=0)
    k = table.shape[0]
    k_pad = _round_up(k, 8)
    if k_pad > k:
        table = jnp.concatenate(
            [table, jnp.zeros((k_pad - k, LANES), jnp.float32)], axis=0)

    # Two-hot gather: each edge row picks its (src-block, dst-block) table rows
    # in a single MXU matmul -> lane-dense 128-wide output rows, unmasked vst.
    idx = idx_ref[...]                                             # [tile_e, 2]
    col = jax.lax.broadcasted_iota(jnp.int32, (idx.shape[0], k_pad), 1)
    two_hot = ((col == idx[:, 0:1]) | (col == idx[:, 1:2])).astype(jnp.float32)
    out_ref[...] = jnp.dot(two_hot, table, preferred_element_type=jnp.float32)


@jax.jit
def decoder_initialize_full_graph(mu, log_var, eps, room_feat,
                                  ff_src, ff_dst, rf_src, rf_dst):
    nf, d = mu.shape
    nr, dr = room_feat.shape
    e_ff = ff_src.shape[0]
    e_rf = rf_src.shape[0]
    assert 2 * d <= LANES and dr + d <= LANES

    # Pack all index vectors into a single [E_pad, 2] int32 input.  The z rows
    # (identity gather of block 0) make z part of the same lane-dense output
    # slab, so the single output's block index varies with the grid axis.
    ff_idx = jnp.stack([ff_src.astype(jnp.int32),
                        nf + ff_dst.astype(jnp.int32)], axis=1)
    rf_idx = jnp.stack([2 * nf + rf_src.astype(jnp.int32),
                        2 * nf + nr + rf_dst.astype(jnp.int32)], axis=1)
    z_idx = jnp.stack([jnp.arange(nf, dtype=jnp.int32),
                       jnp.full((nf,), -1, jnp.int32)], axis=1)
    idx = jnp.concatenate([ff_idx, rf_idx, z_idx], axis=0)

    rows = e_ff + e_rf + nf
    tile_e = min(256, _round_up(rows, 8))       # edge-tile size per grid step
    e_pad = _round_up(rows, tile_e)
    if e_pad > rows:                            # padded rows gather nothing
        idx = jnp.concatenate(
            [idx, jnp.full((e_pad - rows, 2), -1, jnp.int32)], axis=0)

    grid = (e_pad // tile_e,)

    def node_spec(shape):
        # Full-array block, constant index_map -> stays VMEM-resident.
        return pl.BlockSpec(shape, lambda i: (0, 0))

    out = pl.pallas_call(
        _decoder_init_kernel,
        out_shape=jax.ShapeDtypeStruct((e_pad, LANES), jnp.float32),
        grid=grid,
        in_specs=[node_spec((nf, d)),      # mu
                  node_spec((nf, d)),      # log_var
                  node_spec((nf, d)),      # eps
                  node_spec((nr, dr)),     # room features
                  pl.BlockSpec((tile_e, 2), lambda i: (i, 0))],   # packed indices
        out_specs=pl.BlockSpec((tile_e, LANES), lambda i: (i, 0)),
        compiler_params=pltpu.CompilerParams(
            dimension_semantics=("parallel",),        # v7x: shard edge tiles
            vmem_limit_bytes=32 * 1024 * 1024),
    )(mu, log_var, eps, room_feat, idx)

    # Slices back to the exact module shapes.  (A downstream gatlayer kernel
    # could instead consume the 128-lane padded slab directly and skip these.)
    ff_feat = out[:e_ff, :2 * d]
    rf_feat = out[e_ff:e_ff + e_rf, :dr + d]
    z = out[e_ff + e_rf:e_ff + e_rf + nf, :d]
    return z, ff_feat, rf_feat


# ----------------------------------------------------------------------------
# Decoder: reparameterization + initialize_full_graph implemented on TPU.
# ----------------------------------------------------------------------------
class Decoder:
    """Pallas port of networks/AttentionVAE/decoder.py::Decoder.

    Reproduces `reparameterization` and `initialize_full_graph` exactly
    (per-edge concatenation of gathered node features), fused into a single
    edge-tiled pallas_call.
    """
    # TODO(synk): AttentionLayer (gatlayer1/2/3) is not defined anywhere in the
    # provided source, so its forward semantics and parameter shapes cannot be
    # reproduced; the initialized graph (output of initialize_full_graph) is
    # returned instead.

    def __call__(self, graph, mu, log_var, eps):
        ff_src, ff_dst = graph["ff_edges"]
        rf_src, rf_dst = graph["rf_edges"]

        z, ff_feat, rf_feat = decoder_initialize_full_graph(
            mu, log_var, eps, graph["room_feat"],
            ff_src, ff_dst, rf_src, rf_dst)

        out = dict(graph)
        out["furniture_feat"] = z
        out["ff_feat"] = ff_feat
        out["rf_feat"] = rf_feat
        # TODO(synk): apply gatlayer1/2/3 here once AttentionLayer is specified.
        return out


if __name__ == "__main__":
    key = jax.random.PRNGKey(0)
    k_mu, k_lv, k_eps, k_room = jax.random.split(key, 4)

    Nf = 8   # furniture nodes
    Nr = 2   # room nodes

    mu = jax.random.normal(k_mu, (Nf, F_LATENT), dtype=jnp.float32)
    log_var = jax.random.normal(k_lv, (Nf, F_LATENT), dtype=jnp.float32)
    # torch.randn noise is non-deterministic; here the noise is a deterministic
    # input generated from PRNGKey(0).
    eps = jax.random.normal(k_eps, (Nf, F_LATENT), dtype=jnp.float32)
    room_feat = jax.random.normal(k_room, (Nr, R_NFEATURE), dtype=jnp.float32)

    # graph connectivity (stand-in for the DGL heterograph)
    ff_src = jnp.array([0, 1, 2, 3, 4, 5], dtype=jnp.int32)
    ff_dst = jnp.array([1, 2, 3, 4, 5, 6], dtype=jnp.int32)
    rf_src = jnp.array([0, 0, 0, 0, 1, 1, 1, 1], dtype=jnp.int32)
    rf_dst = jnp.array([0, 1, 2, 3, 4, 5, 6, 7], dtype=jnp.int32)

    graph = {
        "room_feat": room_feat,
        "ff_edges": (ff_src, ff_dst),
        "rf_edges": (rf_src, rf_dst),
    }

    decoder = Decoder()
    out = decoder(graph, mu, log_var, eps)
    out = jax.block_until_ready(out)

    # Pure-JAX reference check
    z_ref = mu + jnp.exp(0.5 * log_var) * eps
    ff_ref = jnp.concatenate([z_ref[ff_src], z_ref[ff_dst]], axis=1)
    rf_ref = jnp.concatenate([room_feat[rf_src], z_ref[rf_dst]], axis=1)

    assert out["furniture_feat"].shape == (Nf, F_LATENT)
    assert out["ff_feat"].shape == (ff_src.shape[0], 2 * F_LATENT)
    assert out["rf_feat"].shape == (rf_src.shape[0], R_NFEATURE + F_LATENT)
    assert jnp.allclose(out["furniture_feat"], z_ref, atol=1e-5)
    assert jnp.allclose(out["ff_feat"], ff_ref, atol=1e-5)
    assert jnp.allclose(out["rf_feat"], rf_ref, atol=1e-5)

    print("KERNEL_OK")
</pallas_src>

<mosaic_0001>
module attributes {stable_mosaic.version = 11 : i64} {
  func.func @_decoder_init_kernel(%arg0: i32, %arg1: memref<8x64xf32, #tpu.memory_space<vmem>>, %arg2: memref<8x64xf32, #tpu.memory_space<vmem>>, %arg3: memref<8x64xf32, #tpu.memory_space<vmem>>, %arg4: memref<2x14xf32, #tpu.memory_space<vmem>>, %arg5: memref<24x2xi32, #tpu.memory_space<vmem>>, %arg6: memref<24x128xf32, #tpu.memory_space<vmem>>) attributes {dimension_semantics = [#tpu.dimension_semantics<parallel>], iteration_bounds = array<i64: 1>, scalar_prefetch = 0 : i64, scratch_operands = 0 : i64, tpu.core_type = #tpu.core_type<tc>, window_params = [{pipeline_mode = #tpu.pipeline_mode<synchronous>, transform_indices = @transform_0, window_bounds = array<i64: 8, 64>}, {pipeline_mode = #tpu.pipeline_mode<synchronous>, transform_indices = @transform_1, window_bounds = array<i64: 8, 64>}, {pipeline_mode = #tpu.pipeline_mode<synchronous>, transform_indices = @transform_2, window_bounds = array<i64: 8, 64>}, {pipeline_mode = #tpu.pipeline_mode<synchronous>, transform_indices = @transform_3, window_bounds = array<i64: 2, 14>}, {transform_indices = @transform_4, window_bounds = array<i64: 24, 2>}, {transform_indices = @transform_5, window_bounds = array<i64: 24, 128>}]} {
    %c0 = arith.constant 0 : index
    %c0_0 = arith.constant 0 : index
    %0 = vector.load %arg1[%c0, %c0_0] : memref<8x64xf32, #tpu.memory_space<vmem>>, vector<8x64xf32>
    %c0_1 = arith.constant 0 : index
    %c0_2 = arith.constant 0 : index
    %1 = vector.load %arg2[%c0_1, %c0_2] : memref<8x64xf32, #tpu.memory_space<vmem>>, vector<8x64xf32>
    %cst = arith.constant 5.000000e-01 : f32
    %2 = vector.broadcast %cst : f32 to vector<8x64xf32>
    %3 = arith.mulf %2, %1 : vector<8x64xf32>
    %4 = math.exp %3 : vector<8x64xf32>
    %c0_3 = arith.constant 0 : index
    %c0_4 = arith.constant 0 : index
    %5 = vector.load %arg3[%c0_3, %c0_4] : memref<8x64xf32, #tpu.memory_space<vmem>>, vector<8x64xf32>
    %6 = arith.mulf %4, %5 : vector<8x64xf32>
    %7 = arith.addf %0, %6 : vector<8x64xf32>
    %c0_5 = arith.constant 0 : index
    %c0_6 = arith.constant 0 : index
    %8 = vector.load %arg4[%c0_5, %c0_6] : memref<2x14xf32, #tpu.memory_space<vmem>>, vector<2x14xf32>
    %cst_7 = arith.constant 0.000000e+00 : f32
    %9 = vector.broadcast %cst_7 : f32 to vector<8x64xf32>
    %10 = tpu.concatenate %7, %9 in 1 : vector<8x64xf32>, vector<8x64xf32> -> vector<8x128xf32>
    %cst_8 = arith.constant 0.000000e+00 : f32
    %11 = vector.broadcast %cst_8 : f32 to vector<8x64xf32>
    %12 = tpu.concatenate %11, %7 in 1 : vector<8x64xf32>, vector<8x64xf32> -> vector<8x128xf32>
    %cst_9 = arith.constant 0.000000e+00 : f32
    %13 = vector.broadcast %cst_9 : f32 to vector<2x114xf32>
    %14 = tpu.concatenate %8, %13 in 1 : vector<2x14xf32>, vector<2x114xf32> -> vector<2x128xf32>
    %cst_10 = arith.constant 0.000000e+00 : f32
    %15 = vector.broadcast %cst_10 : f32 to vector<8x14xf32>
    %cst_11 = arith.constant 0.000000e+00 : f32
    %16 = vector.broadcast %cst_11 : f32 to vector<8x50xf32>
    %17 = tpu.concatenate %15, %7, %16 in 1 : vector<8x14xf32>, vector<8x64xf32>, vector<8x50xf32> -> vector<8x128xf32>
    %18 = tpu.concatenate %10, %12, %14, %17 in 0 : vector<8x128xf32>, vector<8x128xf32>, vector<2x128xf32>, vector<8x128xf32> -> vector<26x128xf32>
    %cst_12 = arith.constant 0.000000e+00 : f32
    %19 = vector.broadcast %cst_12 : f32 to vector<6x128xf32>
    %20 = tpu.concatenate %18, %19 in 0 : vector<26x128xf32>, vector<6x128xf32> -> vector<32x128xf32>
    %c0_13 = arith.constant 0 : index
    %c0_14 = arith.constant 0 : index
    %21 = vector.load %arg5[%c0_13, %c0_14] : memref<24x2xi32, #tpu.memory_space<vmem>>, vector<24x2xi32>
    %22 = tpu.iota {dimensions = array<i32: 1>} : vector<24x32xi32>
    %23 = vector.extract_strided_slice %21 {offsets = [0, 0], sizes = [24, 1], strides = [1, 1]} : vector<24x2xi32> to vector<24x1xi32>
    %24 = vector.broadcast %23 : vector<24x1xi32> to vector<24x32xi32>
    %25 = arith.cmpi eq, %22, %24 : vector<24x32xi32>
    %26 = vector.extract_strided_slice %21 {offsets = [0, 1], sizes = [24, 1], strides = [1, 1]} : vector<24x2xi32> to vector<24x1xi32>
    %27 = vector.broadcast %26 : vector<24x1xi32> to vector<24x32xi32>
    %28 = arith.cmpi eq, %22, %27 : vector<24x32xi32>
    %29 = arith.ori %25, %28 : vector<24x32xi1>
    %30 = arith.extui %29 : vector<24x32xi1> to vector<24x32xi32>
    %31 = arith.sitofp %30 : vector<24x32xi32> to vector<24x32xf32>
    %cst_15 = arith.constant dense<0.000000e+00> : vector<24x128xf32>
    %32 = tpu.matmul %31, %20, %cst_15 {dimension_numbers = #tpu.dot_dimension_numbers<[1], [0], [0], [1], [0, 0, 1, 1], [], []>} : vector<24x32xf32>, vector<32x128xf32>, vector<24x128xf32> -> vector<24x128xf32>
    %c0_16 = arith.constant 0 : index
    %c0_17 = arith.constant 0 : index
    %33 = vector.load %arg6[%c0_16, %c0_17] : memref<24x128xf32, #tpu.memory_space<vmem>>, vector<24x128xf32>
    tpu.vector_store %arg6[%c0_16, %c0_17], %32 {strides = array<i32>} : memref<24x128xf32, #tpu.memory_space<vmem>>, vector<24x128xf32>,
    return
  }
  func.func @transform_0(%arg0: i32) -> (i32, i32) {
    %c0_i32 = arith.constant 0 : i32
    %c0_i32_0 = arith.constant 0 : i32
    %c0_i32_1 = arith.constant 0 : i32
    return %c0_i32, %c0_i32_0 : i32, i32
  }
  func.func @transform_1(%arg0: i32) -> (i32, i32) {
    %c0_i32 = arith.constant 0 : i32
    %c0_i32_0 = arith.constant 0 : i32
    %c0_i32_1 = arith.constant 0 : i32
    return %c0_i32, %c0_i32_0 : i32, i32
  }
  func.func @transform_2(%arg0: i32) -> (i32, i32) {
    %c0_i32 = arith.constant 0 : i32
    %c0_i32_0 = arith.constant 0 : i32
    %c0_i32_1 = arith.constant 0 : i32
    return %c0_i32, %c0_i32_0 : i32, i32
  }
  func.func @transform_3(%arg0: i32) -> (i32, i32) {
    %c0_i32 = arith.constant 0 : i32
    %c0_i32_0 = arith.constant 0 : i32
    %c0_i32_1 = arith.constant 0 : i32
    return %c0_i32, %c0_i32_0 : i32, i32
  }
  func.func @transform_4(%arg0: i32) -> (i32, i32) {
    %c0_i32 = arith.constant 0 : i32
    %c0_i32_0 = arith.constant 0 : i32
    return %arg0, %c0_i32 : i32, i32
  }
  func.func @transform_5(%arg0: i32) -> (i32, i32) {
    %c0_i32 = arith.constant 0 : i32
    %c0_i32_0 = arith.constant 0 : i32
    return %arg0, %c0_i32 : i32, i32
  }
}

</mosaic_0001>

<bundles_post_ra>
// kernel: decoder_initialize_full_graph.1
= control target key start
LH: loop header
LB: loop body
LE: loop exit
PB: predicated region body
PF: predicated region fallthrough
CT: control target
= control target key end

     0   :  { %v240_v0 = vmov 1   ;;  %v241_v2 = vmov 0   ;;  %v242_v8 = vmov 0.0   ;;  %s244_s29 = smov 64   ;;  %vm245_vm0 = vmmov 0   ;;  %s329_s4 = inlined_call_operand.vmem [shape: s32[24,2], index: 4, kind: input, shape index: {}]   ;;  %s330_s1 = inlined_call_operand.vmem [shape: f32[8,64], index: 1, kind: input, shape index: {}]   ;;  %s331_s2 = inlined_call_operand.vmem [shape: f32[8,64], index: 2, kind: input, shape index: {}]   ;;  %s332_s0 = inlined_call_operand.vmem [shape: f32[8,64], index: 0, kind: input, shape index: {}]   ;;  %s333_s3 = inlined_call_operand.vmem [shape: f32[2,14], index: 3, kind: input, shape index: {}]   ;;  %s334_s5 = inlined_call_operand.vmem [shape: f32[24,128], index: 5, kind: output, shape index: {}]  }
   0x1   :  { %234 = vset.pattern.permute.xlu1 %v240_v0  ;;  %v51_v1 = vld [vmem:[%s329_s4 + $0x8] sm:$0xff]  ;;  %233 = vset.pattern.permute.xlu0 %v241_v2  ;;  %v21_v3 = vld [vmem:[%s330_s1] sm:$0xff]  ;;  %v52_v7 = vld [vmem:[%s329_s4 + $0x10] sm:$0xff]  ;;  %vm36_vm1 = vcmask 113664   ;;  %vm42_vm2 = vcmask 637952   ;;  %vm47_vm3 = vcmask 1041408   ;;  %v53_v25 = vlaneseq }
   0x2   :  { %71 = vperm.xlu1 %234, %v51_v1   ;;  %v22_v4 = vmul.f32 0.5, %v21_v3  ;;  %v50_v5 = vld [vmem:[%s329_s4] sm:$0xff]  ;;  %202 = vmatprep.subr.mxu0 %v242_v8  ;;  %s243_s4 = smov 14   ;;  %vm29_vm4 = vcmask 523264   ;;  %vm88_vm6 = vcmask 261120  }
   0x3   :  { %219 = vmatprep.subr.mxu1 %v242_v8  ;;  %v25_v9 = vld [vmem:[%s331_s2] sm:$0xff]  ;;  %213 = vmatprep.mubr.msk.f32.mxu1 %vm245_vm0, %v242_v8  ;;  %vm189_vm5 = vmneg %vm29_vm4  ;;  %v54_v27 = vand.u32 127, %v53_v25 }
   0x4   :  { %v23_v6 = vmul.f32 1.442695, %v22_v4  ;;  %v20_v11 = vld [vmem:[%s332_s0] sm:$0xff]  ;;  %210 = vmatprep.mubr.msk.f32.mxu0 %vm245_vm0, %v242_v8 }
   0x5   :  { %v28_v17 = vld [vmem:[%s333_s3] sm:$0x3] }
   0x6   :  { %235 = vset.pattern.permute.xlu1 %v241_v2  ;;  %238 = vpow2.f32 %v23_v6  ;;  %v37_v20 = vsel %vm36_vm1, %v28_v17, 0.0 }
   0x7   :  { %56 = vperm.xlu1 %235, %v50_v5  }
   0xb   :  { %62 = vperm.xlu1 %235, %v52_v7  }
   0xf   :  { %237 = vset.pattern.permute.xlu1 %v240_v0 }
  0x10   :  { %74 = vperm.xlu1 %237, %v52_v7  }
  0x13   :  { %v239_v10 = vpop.eup %238 }
  0x14   :  { %v26_v12 = vmul.f32 %v239_v10, %v25_v9 }
  0x16   :  { %v27_v13 = vadd.f32 %v26_v12, %v20_v11 }
  0x18   :  { %38 = vrot.lane.b32.xlu0 %v27_v13, %s243_s4  ;;  %32 = vrot.lane.b32.xlu1 %v27_v13, %s244_s29 }
  0x1c   :  { %59 = vperm.xlu0 %233, %v51_v1  }
  0x20   :  { %236 = vset.pattern.permute.xlu0 %v240_v0 }
  0x21   :  { %68 = vperm.xlu0 %236, %v50_v5  }
  0x7d   :  { %v72_v14 = vpop.permute.xlu1 %71 }
  0x7e   :  { %vm77_vm7 = vcmp.eq.s32.totalorder %v54_v27, %v72_v14 }
  0x82   :  { %v57_v15 = vpop.permute.xlu1 %56 }
  0x83   :  { %vm64_vm13 = vcmp.eq.s32.totalorder %v54_v27, %v57_v15 }
  0x86   :  { %v63_v16 = vpop.permute.xlu1 %62 }
  0x87   :  { %vm66_vm8 = vcmp.eq.s32.totalorder %v54_v27, %v63_v16 }
  0x8a   :  { %v39_v18 = vpop.permute.xlu0 %38 }
  0x8b   :  { %v41_v19 = vsel %vm36_vm1, 0.0, %v39_v18  ;;  %v75_v22 = vpop.permute.xlu1 %74 }
  0x8c   :  { %v43_v21 = vsel %vm42_vm2, %v41_v19, 0.0  ;;  %vm78_vm9 = vcmp.eq.s32.totalorder %v54_v27, %v75_v22 }
  0x8d   :  { %v45_v23 = vrot.slane %v43_v21, 6  ;;  %vm81_vm12 = vmor %vm66_vm8, %vm78_vm9 }
  0x8e   :  { %v187_v31 = vsel %vm81_vm12, 1.0, %v242_v8 }
  0x8f   :  { %203 = vmatpush3.msk.msra.mxu0 %vm47_vm3, %v45_v23  ;;  %223 = vmatpush3.msk.msra.mxu1 %vm47_vm3, %v45_v23  ;;  %v48_v24 = vsel %vm47_vm3, %v37_v20, %v45_v23  ;;  %v33_v26 = vpop.permute.xlu1 %32 }
  0x90   :  { %204 = vmatprep.subr.mxu0 %v242_v8  ;;  %220 = vmatprep.subr.mxu1 %v242_v8 }
  0x91   :  { %205 = vmatpush3.msra.mxu0 %v48_v24  ;;  %224 = vmatpush3.msra.mxu1 %v48_v24 }
  0x92   :  { %221 = vmatprep.subr.mxu1 %v242_v8  ;;  %206 = vmatprep.subr.mxu0 %v242_v8 }
  0x93   :  { %225 = vmatpush3.msk.msra.mxu1 %vm189_vm5, %v33_v26  ;;  %207 = vmatpush3.msk.msra.mxu0 %vm189_vm5, %v33_v26 }
  0x94   :  { %222 = vmatprep.subr.mxu1 %v242_v8  ;;  %208 = vmatprep.subr.mxu0 %v242_v8 }
  0x95   :  { %226 = vmatpush3.msk.msra.mxu1 %vm29_vm4, %v27_v13  ;;  %209 = vmatpush3.msk.msra.mxu0 %vm29_vm4, %v27_v13 }
  0x97   :  { %v60_v28 = vpop.permute.xlu0 %59 }
  0x98   :  { %vm65_vm10 = vcmp.eq.s32.totalorder %v54_v27, %v60_v28 }
  0x99   :  { %vm80_vm11 = vmor %vm65_vm10, %vm77_vm7 }
  0x9a   :  { %v186_v29 = vsel %vm80_vm11, 1.0, %v242_v8 }
  0x9b   :  { %214 = vmatmul.mubr.msk.f32.vlgmr.msra.gmra.mxu1 %vm88_vm6, %v186_v29 }
  0x9c   :  { %v69_v30 = vpop.permute.xlu0 %68  ;;  %216 = vmatprep.mubr.msk.f32.mxu1 %vm245_vm0, %v242_v8 }
  0x9d   :  { %vm76_vm14 = vcmp.eq.s32.totalorder %v54_v27, %v69_v30 }
  0x9e   :  { %vm79_vm15 = vmor %vm64_vm13, %vm76_vm14 }
  0x9f   :  { %v185_v32 = vsel %vm79_vm15, 1.0, %v242_v8  ;;  %217 = vmatmul.mubr.msk.f32.gmra.mxu1 %vm88_vm6, %v187_v31 }
  0xa0   :  { %211 = vmatmul.mubr.msk.f32.vlgmr.msra.gmra.mxu0 %vm88_vm6, %v185_v32 }
 0x15b   :  { %v169_v33 = vpop.f32.mrf.mxu1 }
 0x15c   :  { %179 = vst [vmem:[%s334_s5 + $0x8] sm:$0xff] %v169_v33 }
 0x15d   :  { %v215_v34 = vpop.f32.mrf.mxu1 }
 0x15f   :  { %v174_v35 = vpop.f32.mrf.mxu1 }
 0x160   :  { %180 = vst [vmem:[%s334_s5 + $0x10] sm:$0xff] %v174_v35  ;;  %v164_v36 = vpop.f32.mrf.mxu0 }
 0x161   :  { %178 = vst [vmem:[%s334_s5] sm:$0xff] %v164_v36  ;;  %v218_v37 = vpop.f32.mrf.mxu1 }
 0x162   :  { %v212_v38 = vpop.f32.mrf.mxu0 }

</bundles_post_ra>
